<compile_context>
chip_gen: v7x
topology: tpu7x:2x2x1
jax: 0.10.0
libtpu: 0.0.40
codegen_flags: <defaults>
</compile_context>

<pallas_src>
import jax
import jax.numpy as jnp
from jax.experimental import pallas as pl
from jax.experimental.pallas import tpu as pltpu


def moe_kernel(x_ref, wcat_ref, w2_ref, ball_ref, out_ref):
    B = x_ref.shape[0]
    H, E = w2_ref.shape                                   # hidden (64), num_experts

    x = x_ref[...]                                        # (B, S, F)
    gin = jnp.mean(x, axis=1)                             # (B, F)   gating_input

    b_all = ball_ref[...]                                 # (1, H + 2E) = [b1 | be | b2]
    b1 = b_all[:, :H]
    be = b_all[:, H:H + E]
    b2 = b_all[:, H + E:H + 2 * E]

    # One fused MXU push: [hidden | expert_outputs] = gin @ [W1 | We]
    he = jnp.dot(gin, wcat_ref[...], preferred_element_type=jnp.float32)   # (B, H+E)
    h = jnp.maximum(he[:, :H] + b1, 0.0)                  # (B, H)   ReLU hidden
    eo = he[:, H:] + be                                   # (B, E)   expert outputs

    # Gating head + softmax(dim=1)
    logits = jnp.dot(h, w2_ref[...], preferred_element_type=jnp.float32) + b2
    logits = logits - jnp.max(logits, axis=1, keepdims=True)
    ex = jnp.exp(logits)
    s = jnp.sum(ex, axis=1, keepdims=True)
    r = pl.reciprocal(s, approx=True)                     # EUP vrcp (free slot)
    r = r * (2.0 - s * r)                                 # one Newton step -> f32 accuracy
    gw_tic = ex * r                                       # (B, E)

    gw = jnp.mean(gw_tic, axis=0, keepdims=True)          # (1, E)   gating_weights
    out = jnp.sum(gw * eo, axis=1, keepdims=True)         # (B, 1)   weighted output

    # Pack both results into one lane-dense (8, 128) slab, stored with a single
    # unmasked full-tile store:
    #   rows 0..B-1 : per-batch output (broadcast across lanes; wrapper reads lane 0)
    #   row B       : gating weights in lanes 0..E-1
    #   rest        : zeros
    R, L = out_ref.shape
    out_rows = jnp.broadcast_to(out, (B, L))                                   # (B, L)
    gw_row = jnp.concatenate([gw, jnp.zeros((1, L - E), jnp.float32)], axis=1) # (1, L)
    zero_rows = jnp.zeros((R - B - 1, L), jnp.float32)
    out_ref[...] = jnp.concatenate([out_rows, gw_row, zero_rows], axis=0)


def moe_forward(batch_x, batch_x_mark, dec_inp, batch_y_mark, params):
    """Returns (output [B], gating_weights [1, E])."""
    del batch_x_mark, dec_inp, batch_y_mark  # unused by the synthetic experts
    B, S, F = batch_x.shape
    H = params["w1"].shape[1]
    E = params["w2"].shape[1]
    assert B + 1 <= 8 and H + 2 * E <= 128 and E <= 128

    # Wrapper-side weight/bias packing (layout plumbing, not compute hoisting):
    #   w_cat = [W1 | We]  (F, H+E),  b_all = [b1 | be | b2]  (1, H+2E)
    w_cat = jnp.concatenate([params["w1"], params["we"]], axis=1)
    b_all = jnp.concatenate([params["b1"], params["be"], params["b2"]], axis=1)

    R, L = 8, 128
    slab = pl.pallas_call(
        moe_kernel,
        out_shape=jax.ShapeDtypeStruct((R, L), jnp.float32),
        in_specs=[pl.BlockSpec(memory_space=pltpu.MemorySpace.VMEM)] * 4,
        out_specs=pl.BlockSpec(memory_space=pltpu.MemorySpace.VMEM),
    )(batch_x, w_cat, params["w2"], b_all)

    out = slab[:B, 0]          # [B]
    gw = slab[B:B + 1, :E]     # [1, E]
    return out, gw


def init_params(key, input_size, num_experts, hidden=64):
    k1, k2, k3, k4, k5, k6 = jax.random.split(key, 6)
    return {
        "w1": jax.random.normal(k1, (input_size, hidden), jnp.float32) * 0.1,
        "b1": jax.random.normal(k2, (1, hidden), jnp.float32) * 0.1,
        "w2": jax.random.normal(k3, (hidden, num_experts), jnp.float32) * 0.1,
        "b2": jax.random.normal(k4, (1, num_experts), jnp.float32) * 0.1,
        # synthetic frozen experts: F -> 1 linear head each, packed as (F, E)
        "we": jax.random.normal(k5, (input_size, num_experts), jnp.float32) * 0.1,
        "be": jax.random.normal(k6, (1, num_experts), jnp.float32) * 0.1,
    }


def moe_ref(batch_x, params):
    gin = jnp.mean(batch_x, axis=1)
    h = jnp.maximum(gin @ params["w1"] + params["b1"], 0.0)
    logits = h @ params["w2"] + params["b2"]
    gw_tic = jax.nn.softmax(logits, axis=1)
    gw = jnp.mean(gw_tic, axis=0, keepdims=True)
    eo = gin @ params["we"] + params["be"]
    out = jnp.sum(gw * eo, axis=1)
    return out, gw


if __name__ == "__main__":
    B, S, F = 2, 8, 32          # batch, seq_len, feature
    P, TF = 4, 5                # pred_len, time_feature
    E = 3                       # num_experts

    key = jax.random.PRNGKey(0)
    kx, kxm, kd, kym, kp = jax.random.split(key, 5)

    batch_x = jax.random.normal(kx, (B, S, F), jnp.float32)
    batch_x_mark = jax.random.normal(kxm, (B, S, TF), jnp.float32)
    dec_inp = jax.random.normal(kd, (B, P, F), jnp.float32)
    batch_y_mark = jax.random.normal(kym, (B, P, TF), jnp.float32)

    params = init_params(kp, F, E)

    out, gw = moe_forward(batch_x, batch_x_mark, dec_inp, batch_y_mark, params)
    out, gw = jax.block_until_ready((out, gw))

    out_ref, gw_ref = moe_ref(batch_x, params)
    assert out.shape == (B,) and gw.shape == (1, E)
    assert jnp.allclose(out, out_ref, atol=1e-5), (out, out_ref)
    assert jnp.allclose(gw, gw_ref, atol=1e-5), (gw, gw_ref)

    print("KERNEL_OK")
</pallas_src>

<mosaic_0001>
module attributes {stable_mosaic.version = 11 : i64} {
  func.func @moe_kernel(%arg0: memref<2x8x32xf32, #tpu.memory_space<vmem>>, %arg1: memref<32x67xf32, #tpu.memory_space<vmem>>, %arg2: memref<64x3xf32, #tpu.memory_space<vmem>>, %arg3: memref<1x70xf32, #tpu.memory_space<vmem>>, %arg4: memref<8x128xf32, #tpu.memory_space<vmem>>) attributes {dimension_semantics = [], scalar_prefetch = 0 : i64, scratch_operands = 0 : i64, tpu.core_type = #tpu.core_type<tc>} {
    %c0 = arith.constant 0 : index
    %c0_0 = arith.constant 0 : index
    %c0_1 = arith.constant 0 : index
    %0 = vector.load %arg0[%c0, %c0_0, %c0_1] : memref<2x8x32xf32, #tpu.memory_space<vmem>>, vector<2x8x32xf32>
    %cst = arith.constant dense<0.000000e+00> : vector<2x32xf32>
    %1 = vector.multi_reduction <add>, %0, %cst [1] : vector<2x8x32xf32> to vector<2x32xf32>
    %cst_2 = arith.constant 8.000000e+00 : f32
    %2 = vector.broadcast %cst_2 : f32 to vector<2x32xf32>
    %3 = arith.divf %1, %2 : vector<2x32xf32>
    %c0_3 = arith.constant 0 : index
    %c0_4 = arith.constant 0 : index
    %4 = vector.load %arg3[%c0_3, %c0_4] : memref<1x70xf32, #tpu.memory_space<vmem>>, vector<1x70xf32>
    %5 = vector.extract_strided_slice %4 {offsets = [0, 0], sizes = [1, 64], strides = [1, 1]} : vector<1x70xf32> to vector<1x64xf32>
    %6 = vector.extract_strided_slice %4 {offsets = [0, 64], sizes = [1, 3], strides = [1, 1]} : vector<1x70xf32> to vector<1x3xf32>
    %7 = vector.extract_strided_slice %4 {offsets = [0, 67], sizes = [1, 3], strides = [1, 1]} : vector<1x70xf32> to vector<1x3xf32>
    %c0_5 = arith.constant 0 : index
    %c0_6 = arith.constant 0 : index
    %8 = vector.load %arg1[%c0_5, %c0_6] : memref<32x67xf32, #tpu.memory_space<vmem>>, vector<32x67xf32>
    %cst_7 = arith.constant dense<0.000000e+00> : vector<2x67xf32>
    %9 = tpu.matmul %3, %8, %cst_7 {dimension_numbers = #tpu.dot_dimension_numbers<[1], [0], [0], [1], [0, 0, 1, 1], [], []>} : vector<2x32xf32>, vector<32x67xf32>, vector<2x67xf32> -> vector<2x67xf32>
    %10 = vector.extract_strided_slice %9 {offsets = [0, 0], sizes = [2, 64], strides = [1, 1]} : vector<2x67xf32> to vector<2x64xf32>
    %11 = vector.broadcast %5 : vector<1x64xf32> to vector<2x64xf32>
    %12 = arith.addf %10, %11 : vector<2x64xf32>
    %cst_8 = arith.constant 0.000000e+00 : f32
    %13 = vector.broadcast %cst_8 : f32 to vector<2x64xf32>
    %14 = arith.maximumf %12, %13 : vector<2x64xf32>
    %15 = vector.extract_strided_slice %9 {offsets = [0, 64], sizes = [2, 3], strides = [1, 1]} : vector<2x67xf32> to vector<2x3xf32>
    %16 = vector.broadcast %6 : vector<1x3xf32> to vector<2x3xf32>
    %17 = arith.addf %15, %16 : vector<2x3xf32>
    %c0_9 = arith.constant 0 : index
    %c0_10 = arith.constant 0 : index
    %18 = vector.load %arg2[%c0_9, %c0_10] : memref<64x3xf32, #tpu.memory_space<vmem>>, vector<64x3xf32>
    %cst_11 = arith.constant dense<0.000000e+00> : vector<2x3xf32>
    %19 = tpu.matmul %14, %18, %cst_11 {dimension_numbers = #tpu.dot_dimension_numbers<[1], [0], [0], [1], [0, 0, 1, 1], [], []>} : vector<2x64xf32>, vector<64x3xf32>, vector<2x3xf32> -> vector<2x3xf32>
    %20 = vector.broadcast %7 : vector<1x3xf32> to vector<2x3xf32>
    %21 = arith.addf %19, %20 : vector<2x3xf32>
    %cst_12 = arith.constant dense<0xFF800000> : vector<2xf32>
    %22 = vector.multi_reduction <maximumf>, %21, %cst_12 [1] : vector<2x3xf32> to vector<2xf32>
    %23 = vector.shape_cast %22 : vector<2xf32> to vector<2x1xf32>
    %24 = vector.broadcast %23 : vector<2x1xf32> to vector<2x3xf32>
    %25 = arith.subf %21, %24 : vector<2x3xf32>
    %26 = math.exp %25 : vector<2x3xf32>
    %cst_13 = arith.constant dense<0.000000e+00> : vector<2xf32>
    %27 = vector.multi_reduction <add>, %26, %cst_13 [1] : vector<2x3xf32> to vector<2xf32>
    %28 = vector.shape_cast %27 : vector<2xf32> to vector<2x1xf32>
    %29 = tpu.reciprocal %28 {approx = true} : vector<2x1xf32> -> vector<2x1xf32>
    %30 = arith.mulf %28, %29 : vector<2x1xf32>
    %cst_14 = arith.constant 2.000000e+00 : f32
    %31 = vector.broadcast %cst_14 : f32 to vector<2x1xf32>
    %32 = arith.subf %31, %30 : vector<2x1xf32>
    %33 = arith.mulf %29, %32 : vector<2x1xf32>
    %34 = vector.broadcast %33 : vector<2x1xf32> to vector<2x3xf32>
    %35 = arith.mulf %26, %34 : vector<2x3xf32>
    %cst_15 = arith.constant dense<0.000000e+00> : vector<3xf32>
    %36 = vector.multi_reduction <add>, %35, %cst_15 [0] : vector<2x3xf32> to vector<3xf32>
    %37 = vector.shape_cast %36 : vector<3xf32> to vector<1x3xf32>
    %cst_16 = arith.constant 2.000000e+00 : f32
    %38 = vector.broadcast %cst_16 : f32 to vector<1x3xf32>
    %39 = arith.divf %37, %38 : vector<1x3xf32>
    %40 = vector.broadcast %39 : vector<1x3xf32> to vector<2x3xf32>
    %41 = arith.mulf %40, %17 : vector<2x3xf32>
    %cst_17 = arith.constant dense<0.000000e+00> : vector<2xf32>
    %42 = vector.multi_reduction <add>, %41, %cst_17 [1] : vector<2x3xf32> to vector<2xf32>
    %43 = vector.shape_cast %42 : vector<2xf32> to vector<2x1xf32>
    %44 = vector.shape_cast %43 : vector<2x1xf32> to vector<2x1xf32>
    %45 = vector.broadcast %44 : vector<2x1xf32> to vector<2x128xf32>
    %cst_18 = arith.constant 0.000000e+00 : f32
    %46 = vector.broadcast %cst_18 : f32 to vector<1x125xf32>
    %47 = tpu.concatenate %39, %46 in 1 : vector<1x3xf32>, vector<1x125xf32> -> vector<1x128xf32>
    %cst_19 = arith.constant 0.000000e+00 : f32
    %48 = vector.broadcast %cst_19 : f32 to vector<5x128xf32>
    %49 = tpu.concatenate %45, %47, %48 in 0 : vector<2x128xf32>, vector<1x128xf32>, vector<5x128xf32> -> vector<8x128xf32>
    %c0_20 = arith.constant 0 : index
    %c0_21 = arith.constant 0 : index
    %50 = vector.load %arg4[%c0_20, %c0_21] : memref<8x128xf32, #tpu.memory_space<vmem>>, vector<8x128xf32>
    tpu.vector_store %arg4[%c0_20, %c0_21], %49 {strides = array<i32>} : memref<8x128xf32, #tpu.memory_space<vmem>>, vector<8x128xf32>,
    return
  }
}

</mosaic_0001>

<bundles_post_ra>
// kernel: tpu_custom_call.1
= control target key start
LH: loop header
LB: loop body
LE: loop exit
PB: predicated region body
PF: predicated region fallthrough
CT: control target
= control target key end

     0   :  { %v367_v3 = vmov 0.0|0.0   ;;  %vm368_vm0 = vmmov 0   ;;  %v369_v6 = vmov 0.0   ;;  %vm20_vm1 = vcmask 261120   ;;  %s462_s0 = inlined_call_operand.vmem [shape: f32[2,8,32], index: 0, kind: input, shape index: {}]   ;;  %s463_s1 = inlined_call_operand.vmem [shape: f32[32,67], index: 1, kind: input, shape index: {}]   ;;  %s464_s2 = inlined_call_operand.vmem [shape: f32[64,3], index: 2, kind: input, shape index: {}]   ;;  %s465_s3 = inlined_call_operand.vmem [shape: f32[1,70], index: 3, kind: input, shape index: {}]   ;;  %s466_s4 = inlined_call_operand.hbm [shape: f32[8,128], index: 4, kind: output, shape index: {}]  }
   0x1   :  { %v39_v0 = vld [vmem:[%s463_s1] sm:$0xff]  ;;  %v40_v1 = vld [vmem:[%s463_s1 + $0x8] sm:$0xff]  ;;  %v41_v2 = vld [vmem:[%s463_s1 + $0x10] sm:$0xff]  ;;  %315 = vmatprep.subr.bf16.mxu0 %v367_v3  ;;  %293 = vmatprep.mubr.msk.f32.mxu0 %vm368_vm0, %v369_v6 }
   0x2   :  { %v316_v4 = vpack.c.bf16 %v40_v1, %v39_v0  ;;  %v42_v5 = vld [vmem:[%s463_s1 + $0x18] sm:$0xff]  ;;  %v18_v7 = vld [vmem:[%s462_s0] sm:$0xff]  ;;  %v19_v8 = vld [vmem:[%s462_s0 + $0x8] sm:$0xff]  ;;  %321 = vmatprep.subr.bf16.mxu1 %v367_v3  ;;  %312 = vmatprep.mubr.msk.f32.mxu1 %vm368_vm0, %v369_v6 }
   0x3   :  { %v21_v9 = vsel %vm20_vm1, %v18_v7, 0.0  ;;  %v28_v10 = vsel %vm20_vm1, %v19_v8, 0.0  ;;  %v127_v11 = vld [vmem:[%s464_s2] sm:$0xff]  ;;  %v128_v12 = vld [vmem:[%s464_s2 + $0x8] sm:$0xff]  ;;  %v129_v13 = vld [vmem:[%s464_s2 + $0x10] sm:$0xff]  ;;  %v319_v14 = vpack.c.bf16 %v42_v5, %v41_v2 }
   0x4   :  { %317 = vmatpush3.bf16.msra.mxu0 %v316_v4  ;;  %v22_v15 = vrot.slane %v21_v9, 4  ;;  %v29_v16 = vrot.slane %v28_v10, 4  ;;  %v322_v17 = vpack.c.bf16 %v128_v12, %v127_v11  ;;  %v130_v18 = vld [vmem:[%s464_s2 + $0x18] sm:$0xff] }
   0x5   :  { %318 = vmatprep.subr.bf16.mxu0 %v367_v3 }
   0x6   :  { %9 = vsyncpa [#allocation3], 0  ;;  %v23_v19 = vadd.f32 %v22_v15, %v21_v9  ;;  %v30_v20 = vadd.f32 %v29_v16, %v28_v10  ;;  %323 = vmatpush3.bf16.msra.mxu1 %v322_v17  ;;  %v325_v21 = vpack.c.bf16 %v130_v18, %v129_v13  ;;  %v131_v22 = vld [vmem:[%s464_s2 + $0x20] sm:$0xff]  ;;  %v132_v23 = vld [vmem:[%s464_s2 + $0x28] sm:$0xff]  ;;  %vm45_vm2 = vcmask 1041409   ;;  %s370_s17 = smov 61  }
   0x7   :  { %324 = vmatprep.subr.bf16.mxu1 %v367_v3  ;;  %v328_v28 = vpack.c.bf16 %v132_v23, %v131_v22  ;;  %v133_v36 = vld [vmem:[%s464_s2 + $0x30] sm:$0xff]  ;;  %v134_v37 = vld [vmem:[%s464_s2 + $0x38] sm:$0xff]  ;;  %v269_v39 = vld [vmem:[%s465_s3] ss:$0 sm:$0xff]  ;;  %vm138_vm3 = vcmask 523264   ;;  %vm212_vm4 = vcmask 17408  }
   0x8   :  { %320 = vmatpush3.bf16.msra.mxu0 %v319_v14  ;;  %v24_v24 = vrot.slane %v23_v19, 2  ;;  %v31_v25 = vrot.slane %v30_v20, 2  ;;  %v331_v38 = vpack.c.bf16 %v134_v37, %v133_v36  ;;  %135 = vrot.lane.b32.xlu0 %v269_v39, %s370_s17  ;;  %s371_s2 = smov 64   ;;  %vm244_vm5 = vcmask 23552   ;;  %s372_s3 = smov [#allocation2]  }
   0x9   :  { %vm249_vm6 = vcmask 1041408   ;;  %s260_s18 = sshll.u32 %s372_s3, 4  ;;  %vm251_vm7 = vcmask 1042432   ;;  %s261_s18 = int_to_ptr.vmem [resolvable:$true] %s260_s18 }
   0xa   :  { %v25_v26 = vadd.f32 %v24_v24, %v23_v19  ;;  %v32_v27 = vadd.f32 %v31_v25, %v30_v20  ;;  %326 = vmatpush3.bf16.msra.mxu1 %v325_v21  ;;  %s343_s19 = scalar_lea.vmem %s261_s18, 128  ;;  %p348_p1 = scmp.lt.s32.totalorder %s261_s18, %s261_s18 }
   0xb   :  { %327 = vmatprep.subr.bf16.mxu1 %v367_v3  ;;  %p344_p0 = scmp.ne.s32.totalorder %s261_s18, %s343_s19  ;;  %p349_p2 = scmp.lt.s32.totalorder %s343_s19, %s343_s19 }
   0xc   :  { %v26_v29 = vrot.slane %v25_v26, 1  ;;  %v33_v30 = vrot.slane %v32_v27, 1 }
   0xd   :  { %p350_p3 = por %p349_p2, %p348_p1 }
   0xe   :  { %v27_v31 = vadd.f32 %v26_v29, %v25_v26  ;;  %v34_v32 = vadd.f32 %v33_v30, %v32_v27  ;;  %329 = vmatpush3.bf16.msra.mxu1 %v328_v28 }
   0xf   :  { %330 = vmatprep.subr.bf16.mxu1 %v367_v3  ;;  %p351_p4 = pnand %p350_p3, %p344_p0 }
  0x10   :  { %v36_v33 = vmul.f32 0.125, %v27_v31  ;;  %v37_v34 = vmul.f32 0.125, %v34_v32 }
  0x12   :  { %v46_v35 = vsel %vm45_vm2, %v37_v34, %v36_v33  ;;  %332 = vmatpush3.bf16.msra.mxu1 %v331_v38 }
  0x13   :  { %294 = vmatmul.mubr.msk.f32.vlgmr.msra.gmra.mrb[0].mxu0 %vm20_vm1, %v46_v35 }
  0x7a   :  { %v136_v44 = vpop.permute.xlu0 %135 }
  0xe6   :  { %v115_v40 = vpop.f32.mrb[0].mxu0 }
  0xe7   :  { %v125_v41 = vadd.f32 %v269_v39, %v115_v40  ;;  %v295_v42 = vpop.f32.mrb[1].mxu0 }
  0xe9   :  { %v126_v43 = vmax.f32 %v125_v41, 0.0 }
  0xeb   :  { %313 = vmatmul.mubr.msk.f32.vlgmr.msra.gmra.mrb[0].mxu1 %vm138_vm3, %v126_v43 }
 0x1be   :  { %v208_v45 = vpop.f32.mrb[0].mxu1 }
 0x1bf   :  { %v209_v46 = vadd.f32 %v208_v45, %v136_v44  ;;  %v314_v47 = vpop.f32.mrb[1].mxu1 }
 0x1c1   :  { %v213_v48 = vsel %vm212_vm4, %v209_v46, -inf }
 0x1c2   :  { %214 = vmax.xlane.f32.xlu0 %v213_v48 }
 0x24f   :  { %v215_v49 = vpop.xlane.xlu0 %214 }
 0x250   :  { %v216_v50 = vsub.f32 %v209_v46, %v215_v49 }
 0x252   :  { %v217_v51 = vmul.f32 1.442695, %v216_v50 }
 0x254   :  { %339 = vpow2.f32 %v217_v51 }
 0x25e   :  { %v340_v52 = vpop.eup %339 }
 0x25f   :  { %v219_v53 = vsel %vm212_vm4, %v340_v52, 0.0 }
 0x260   :  { %220 = vadd.xlane.f32.xlu1 %v219_v53 }
 0x271   :  { %237 = vrot.lane.b32.xlu1 %v125_v41, %s371_s2 }
 0x2ed   :  { %v221_v54 = vpop.xlane.xlu1 %220 }
 0x2ee   :  { %341 = vrcp.f32 %v221_v54 }
 0x2f1   :  { %v238_v4 = vpop.permute.xlu1 %237 }
 0x2f8   :  { %v342_v55 = vpop.eup %341 }
 0x2f9   :  { %v223_v56 = vmul.f32 %v342_v55, %v221_v54 }
 0x2fb   :  { %v224_v57 = vsub.f32 2.0, %v223_v56 }
 0x2fd   :  { %v225_v58 = vmul.f32 %v342_v55, %v224_v57 }
 0x2ff   :  { %v226_v59 = vmul.f32 %v340_v52, %v225_v58 }
 0x301   :  { %v227_v60 = vsel %vm212_vm4, %v226_v59, 0.0 }
 0x302   :  { %v228_v61 = vrot.slane %v227_v60, 4 }
 0x304   :  { %v229_v62 = vadd.f32 %v228_v61, %v227_v60 }
 0x306   :  { %v230_v63 = vrot.slane %v229_v62, 2 }
 0x308   :  { %v231_v0 = vadd.f32 %v230_v63, %v229_v62 }
 0x30a   :  { %v232_v1 = vrot.slane %v231_v0, 1 }
 0x30c   :  { %v233_v2 = vadd.f32 %v232_v1, %v231_v0 }
 0x30e   :  { %v235_v3 = vmul.f32 0.5, %v233_v2 }
 0x310   :  { %v240_v5 = vmul.f32 %v238_v4, %v235_v3  ;;  %v245_v7 = vsel %vm244_vm5, %v235_v3, 0.0 }
 0x311   :  { %v247_v8 = vrot.slane %v245_v7, 6 }
 0x312   :  { %v241_v6 = vsel %vm212_vm4, %v240_v5, 0.0 }
 0x313   :  { %242 = vadd.xlane.f32.xlu1 %v241_v6 }
 0x3a0   :  { %v243_v9 = vpop.xlane.xlu1 %242 }
 0x3a1   :  { %v250_v10 = vsel %vm249_vm6, %v243_v9, %v247_v8 }
 0x3a2   :  { %v252_v11 = vsel %vm251_vm7, %v250_v10, 0.0 }
 0x3a3   :  { %253 = vst [vmem:[#allocation2] sm:$0xff] %v252_v11 }
 0x3a4   :  { %354 = shalt.err (!%p351_p4)
}
 0x3a5   :  { %s355_s22 = scalar_lea.hbm %s466_s4, 128 }
 0x3a6   :  { %p356_p5 = scmp.ne.s32.totalorder %s466_s4, %s355_s22  ;;  %p359_p6 = scmp.lt.u32.totalorder %s355_s22, %s466_s4 }
 0x3a8   :  { %p361_p7 = pnand %p359_p6, %p356_p5 }
 0x3aa   :  { %364 = shalt.err (!%p361_p7)
}
 0x3ab   :  { %263 = dma.vmem_to_hbm [thread:$0]  %s261_s18, 128, %s466_s4, [#allocation3]  }
 0x3ac   :  { %365 = dma.done.wait [#allocation3], 128  }
 0x3ad   :  { %366 = vsyncadd [#allocation3], 4294967168 }
 0x3ae   :  { %267 = vsyncpa [#allocation3], 1 }

</bundles_post_ra>
